<compile_context>
chip_gen: v7x
topology: tpu7x:2x2x1
jax: 0.10.0
libtpu: 0.0.40
codegen_flags: <defaults>
</compile_context>

<pallas_src>
import functools
import math

import jax
import jax.numpy as jnp
from jax.experimental import pallas as pl
from jax.experimental.pallas import tpu as pltpu

EPS = 1e-5
LANE = 128
SUBLANE = 8
VMEM_LIMIT = 32 * 1024 * 1024  # safe scoped-VMEM cap on v5e / v6e / v7x


def _round_up(x, m):
    return (x + m - 1) // m * m


# ------------------------------------------------------------------
# K1: per-channel sum / sum-of-squares over all N*H*W rows
# ------------------------------------------------------------------
def _stats_kernel(x_ref, sum_ref, sq_ref):
    n = pl.program_id(0)
    t = pl.program_id(1)

    @pl.when((n == 0) & (t == 0))
    def _():
        sum_ref[...] = jnp.zeros_like(sum_ref)
        sq_ref[...] = jnp.zeros_like(sq_ref)

    x = x_ref[0]                                        # (THW, C_pad)
    sum_ref[...] += jnp.sum(x, axis=0, keepdims=True)   # zero-padded rows add 0
    sq_ref[...] += jnp.sum(x * x, axis=0, keepdims=True)


# ------------------------------------------------------------------
# K2: BN-apply + ReLU fused with the global-average-pool reduction
# ------------------------------------------------------------------
def _bn_relu_gap_kernel(x_ref, sum_ref, sq_ref, g_ref, b_ref, o_ref, *,
                        inv_count, inv_hw, hw, thw, mask_rows, eps):
    t = pl.program_id(1)

    @pl.when(t == 0)
    def _():
        o_ref[...] = jnp.zeros_like(o_ref)

    mean = sum_ref[...] * inv_count                     # (1, C_pad)
    var = sq_ref[...] * inv_count - mean * mean
    scale = g_ref[...] * jax.lax.rsqrt(var + eps)
    shift = b_ref[...] - mean * scale

    x = x_ref[0]                                        # (THW, C_pad)
    y = jnp.maximum(x * scale + shift, 0.0)
    if mask_rows:                                       # drop zero-padded rows
        row = jax.lax.broadcasted_iota(jnp.int32, (thw, 1), 0) + t * thw
        y = jnp.where(row < hw, y, 0.0)
    partial = jnp.sum(y, axis=0, keepdims=True) * inv_hw
    o_ref[...] += partial.reshape(o_ref.shape)


# ------------------------------------------------------------------
# K3: dense head (pooled @ W + b) on the MXU, lane-dense output
# ------------------------------------------------------------------
def _linear_kernel(x_ref, w_ref, b_ref, o_ref):
    o_ref[...] = (
        jnp.dot(x_ref[...], w_ref[...], preferred_element_type=jnp.float32)
        + b_ref[...]
    )


# ------------------------------------------------------------------
# One classifier head: BN(batch stats) + ReLU + global avg pool + Linear
# ------------------------------------------------------------------
@jax.jit
def _classifier(p, x_nchw):
    x = x_nchw.astype(jnp.float32)
    n, c, h, w = x.shape
    assert h == w, "AdaAvgPool(size=0) requires square spatial input"
    hw = h * w
    c_pad = _round_up(c, LANE)

    # Row-tile size: biggest tile whose double-buffered block stays well under
    # scoped VMEM on every generation (v7x has the smallest: 64 MiB physical).
    max_rows = max(SUBLANE, (4 * 1024 * 1024) // (c_pad * 4) // SUBLANE * SUBLANE)
    thw = min(max_rows, 1024, _round_up(hw, SUBLANE))
    hw_pad = _round_up(hw, thw)
    n_tiles = hw_pad // thw

    # NCHW -> (N, HW, C) channels-last, zero-padded to (N, hw_pad, c_pad).
    x3 = jnp.transpose(x, (0, 2, 3, 1)).reshape(n, hw, c)
    x3 = jnp.pad(x3, ((0, 0), (0, hw_pad - hw), (0, c_pad - c)))

    gamma = jnp.pad(p["bn_gamma"].astype(jnp.float32), (0, c_pad - c)).reshape(1, c_pad)
    beta = jnp.pad(p["bn_beta"].astype(jnp.float32), (0, c_pad - c)).reshape(1, c_pad)

    # ---- K1: batch statistics --------------------------------------------
    sums, sqs = pl.pallas_call(
        _stats_kernel,
        grid=(n, n_tiles),
        in_specs=[pl.BlockSpec((1, thw, c_pad), lambda i, t: (i, t, 0))],
        out_specs=(
            pl.BlockSpec((1, c_pad), lambda i, t: (0, 0)),
            pl.BlockSpec((1, c_pad), lambda i, t: (0, 0)),
        ),
        out_shape=(
            jax.ShapeDtypeStruct((1, c_pad), jnp.float32),
            jax.ShapeDtypeStruct((1, c_pad), jnp.float32),
        ),
        compiler_params=pltpu.CompilerParams(
            dimension_semantics=("arbitrary", "arbitrary"),
            vmem_limit_bytes=VMEM_LIMIT,
        ),
    )(x3)

    # ---- K2: normalize + ReLU + global average pool (fused) ---------------
    gap_kernel = functools.partial(
        _bn_relu_gap_kernel,
        inv_count=1.0 / float(n * hw),
        inv_hw=1.0 / float(hw),
        hw=hw,
        thw=thw,
        mask_rows=(hw_pad != hw),
        eps=EPS,
    )
    pooled = pl.pallas_call(
        gap_kernel,
        grid=(n, n_tiles),
        in_specs=[
            pl.BlockSpec((1, thw, c_pad), lambda i, t: (i, t, 0)),
            pl.BlockSpec((1, c_pad), lambda i, t: (0, 0)),
            pl.BlockSpec((1, c_pad), lambda i, t: (0, 0)),
            pl.BlockSpec((1, c_pad), lambda i, t: (0, 0)),
            pl.BlockSpec((1, c_pad), lambda i, t: (0, 0)),
        ],
        out_specs=pl.BlockSpec((1, 1, c_pad), lambda i, t: (i, 0, 0)),
        out_shape=jax.ShapeDtypeStruct((n, 1, c_pad), jnp.float32),
        compiler_params=pltpu.CompilerParams(
            dimension_semantics=("parallel", "arbitrary"),
            vmem_limit_bytes=VMEM_LIMIT,
        ),
    )(x3, sums, sqs, gamma, beta)
    pooled = pooled.reshape(n, c_pad)

    # ---- K3: Linear head ---------------------------------------------------
    nclass = p["fc_w"].shape[1]
    nc_pad = _round_up(nclass, LANE)
    m_pad = _round_up(max(n, SUBLANE), SUBLANE)
    tm = min(256, m_pad)
    m_pad = _round_up(m_pad, tm)

    pooled_p = jnp.pad(pooled, ((0, m_pad - n), (0, 0)))
    w_p = jnp.pad(p["fc_w"].astype(jnp.float32),
                  ((0, c_pad - c), (0, nc_pad - nclass)))
    b_p = jnp.pad(p["fc_b"].astype(jnp.float32), (0, nc_pad - nclass)).reshape(1, nc_pad)

    logits = pl.pallas_call(
        _linear_kernel,
        grid=(m_pad // tm,),
        in_specs=[
            pl.BlockSpec((tm, c_pad), lambda i: (i, 0)),
            pl.BlockSpec((c_pad, nc_pad), lambda i: (0, 0)),
            pl.BlockSpec((1, nc_pad), lambda i: (0, 0)),
        ],
        out_specs=pl.BlockSpec((tm, nc_pad), lambda i: (i, 0)),
        out_shape=jax.ShapeDtypeStruct((m_pad, nc_pad), jnp.float32),
        compiler_params=pltpu.CompilerParams(
            dimension_semantics=("parallel",),
            vmem_limit_bytes=VMEM_LIMIT,
        ),
    )(pooled_p, w_p, b_p)

    return logits[:n, :nclass]


# ------------------------------------------------------------------
# Parameters (fresh PyTorch-style init) and forward
# ------------------------------------------------------------------
def init_params(key, depth, nclass, classify=1):
    def head(k):
        kw, kb = jax.random.split(k)
        bound = 1.0 / math.sqrt(depth)
        return {
            "bn_gamma": jnp.ones((depth,), jnp.float32),
            "bn_beta": jnp.zeros((depth,), jnp.float32),
            # stored as (in_features, out_features); PyTorch Linear init bounds
            "fc_w": jax.random.uniform(kw, (depth, nclass), jnp.float32, -bound, bound),
            "fc_b": jax.random.uniform(kb, (nclass,), jnp.float32, -bound, bound),
        }

    k1, k2 = jax.random.split(key)
    params = {"classifier1": head(k1)}
    if classify >= 2:
        params["classifier2"] = head(k2)
    return params


def sumary_block_forward(params, x, classify=1):
    """Mirrors SumaryBlock.forward."""
    if isinstance(x, (list, tuple)):
        x1, x2, pred = x
    else:
        x1, x2, pred = x, None, None
    if pred is None:
        pred = []  # PyTorch would raise here; keep the usable list-input path
    if classify == 1:
        out1 = _classifier(params["classifier1"], x1)
        pred.extend([out1])
    elif classify == 2:
        out1 = _classifier(params["classifier1"], x1)
        out2 = _classifier(params["classifier2"], x2)
        pred.extend([out2, out1])
    else:
        raise NotImplementedError
    return pred


# Pure-JAX reference for correctness checking (batch-stats BN, eps=1e-5).
def sumary_block_reference(p, x1):
    x = x1.astype(jnp.float32)
    mean = jnp.mean(x, axis=(0, 2, 3), keepdims=True)
    var = jnp.mean(jnp.square(x - mean), axis=(0, 2, 3), keepdims=True)
    g = p["bn_gamma"].reshape(1, -1, 1, 1)
    b = p["bn_beta"].reshape(1, -1, 1, 1)
    y = jnp.maximum((x - mean) * jax.lax.rsqrt(var + EPS) * g + b, 0.0)
    pooled = jnp.mean(y, axis=(2, 3))
    return pooled @ p["fc_w"] + p["fc_b"]


# ------------------------------------------------------------------
if __name__ == "__main__":
    key = jax.random.PRNGKey(0)
    kp, kx = jax.random.split(key)

    # depth / nclass deliberately NOT multiples of 128 to exercise the
    # lane-padding path; spatial is square (AdaAvgPool(size=0) requirement).
    depth, nclass = 96, 10
    batch, spatial = 4, 16

    params = init_params(kp, depth, nclass, classify=1)
    x1 = jax.random.normal(kx, (batch, depth, spatial, spatial), jnp.float32)

    # SumaryBlock expects [x1, x2, pred] with a mutable pred list.
    pred = sumary_block_forward(params, [x1, None, []], classify=1)
    pred = [jax.block_until_ready(t) for t in pred]

    assert len(pred) == 1
    assert pred[0].shape == (batch, nclass)
    assert bool(jnp.all(jnp.isfinite(pred[0])))

    ref = sumary_block_reference(params["classifier1"], x1)
    err = float(jnp.max(jnp.abs(pred[0] - ref)))
    assert err < 2e-3, f"mismatch vs pure-JAX reference: {err}"

    print("KERNEL_OK")
</pallas_src>

<mosaic_0001>
module attributes {stable_mosaic.version = 11 : i64} {
  func.func @_bn_relu_gap_kernel(%arg0: i32, %arg1: i32, %arg2: memref<1x256x128xf32, #tpu.memory_space<vmem>>, %arg3: memref<1x128xf32, #tpu.memory_space<vmem>>, %arg4: memref<1x128xf32, #tpu.memory_space<vmem>>, %arg5: memref<1x128xf32, #tpu.memory_space<vmem>>, %arg6: memref<1x128xf32, #tpu.memory_space<vmem>>, %arg7: memref<1x1x128xf32, #tpu.memory_space<vmem>>) attributes {dimension_semantics = [#tpu.dimension_semantics<parallel>, #tpu.dimension_semantics<arbitrary>], iteration_bounds = array<i64: 4, 1>, scalar_prefetch = 0 : i64, scratch_operands = 0 : i64, tpu.core_type = #tpu.core_type<tc>, window_params = [{transform_indices = @transform_0, window_bounds = array<i64: 1, 256, 128>}, {pipeline_mode = #tpu.pipeline_mode<synchronous>, transform_indices = @transform_1, window_bounds = array<i64: 1, 128>}, {pipeline_mode = #tpu.pipeline_mode<synchronous>, transform_indices = @transform_2, window_bounds = array<i64: 1, 128>}, {pipeline_mode = #tpu.pipeline_mode<synchronous>, transform_indices = @transform_3, window_bounds = array<i64: 1, 128>}, {pipeline_mode = #tpu.pipeline_mode<synchronous>, transform_indices = @transform_4, window_bounds = array<i64: 1, 128>}, {transform_indices = @transform_5, window_bounds = array<i64: 1, 1, 128>}]} {
    %c0_i32 = arith.constant 0 : i32
    %0 = arith.cmpi eq, %arg1, %c0_i32 : i32
    %1 = arith.extui %0 : i1 to i32
    %c0_i32_0 = arith.constant 0 : i32
    %2 = arith.cmpi ne, %1, %c0_i32_0 : i32
    scf.if %2 {
      %cst_22 = arith.constant 0.000000e+00 : f32
      %35 = vector.broadcast %cst_22 : f32 to vector<1x1x128xf32>
      %c0_23 = arith.constant 0 : index
      %c0_24 = arith.constant 0 : index
      %c0_25 = arith.constant 0 : index
      %36 = vector.load %arg7[%c0_23, %c0_24, %c0_25] : memref<1x1x128xf32, #tpu.memory_space<vmem>>, vector<1x1x128xf32>
      tpu.vector_store %arg7[%c0_23, %c0_24, %c0_25], %35 {strides = array<i32>} : memref<1x1x128xf32, #tpu.memory_space<vmem>>, vector<1x1x128xf32>,
    } else {
    }
    %c0 = arith.constant 0 : index
    %c0_1 = arith.constant 0 : index
    %3 = vector.load %arg3[%c0, %c0_1] : memref<1x128xf32, #tpu.memory_space<vmem>>, vector<1x128xf32>
    %cst = arith.constant 9.765625E-4 : f32
    %4 = vector.broadcast %cst : f32 to vector<1x128xf32>
    %5 = arith.mulf %3, %4 : vector<1x128xf32>
    %c0_2 = arith.constant 0 : index
    %c0_3 = arith.constant 0 : index
    %6 = vector.load %arg4[%c0_2, %c0_3] : memref<1x128xf32, #tpu.memory_space<vmem>>, vector<1x128xf32>
    %cst_4 = arith.constant 9.765625E-4 : f32
    %7 = vector.broadcast %cst_4 : f32 to vector<1x128xf32>
    %8 = arith.mulf %6, %7 : vector<1x128xf32>
    %9 = arith.mulf %5, %5 : vector<1x128xf32>
    %10 = arith.subf %8, %9 : vector<1x128xf32>
    %c0_5 = arith.constant 0 : index
    %c0_6 = arith.constant 0 : index
    %11 = vector.load %arg5[%c0_5, %c0_6] : memref<1x128xf32, #tpu.memory_space<vmem>>, vector<1x128xf32>
    %cst_7 = arith.constant 9.99999974E-6 : f32
    %12 = vector.broadcast %cst_7 : f32 to vector<1x128xf32>
    %13 = arith.addf %10, %12 : vector<1x128xf32>
    %14 = math.rsqrt %13 : vector<1x128xf32>
    %15 = arith.mulf %11, %14 : vector<1x128xf32>
    %c0_8 = arith.constant 0 : index
    %c0_9 = arith.constant 0 : index
    %16 = vector.load %arg6[%c0_8, %c0_9] : memref<1x128xf32, #tpu.memory_space<vmem>>, vector<1x128xf32>
    %17 = arith.mulf %5, %15 : vector<1x128xf32>
    %18 = arith.subf %16, %17 : vector<1x128xf32>
    %c0_10 = arith.constant 0 : index
    %c0_11 = arith.constant 0 : index
    %c0_12 = arith.constant 0 : index
    %19 = vector.load %arg2[%c0_10, %c0_11, %c0_12] : memref<1x256x128xf32, #tpu.memory_space<vmem>>, vector<1x256x128xf32>
    %20 = vector.shape_cast %19 : vector<1x256x128xf32> to vector<256x128xf32>
    %21 = vector.broadcast %15 : vector<1x128xf32> to vector<256x128xf32>
    %22 = arith.mulf %20, %21 : vector<256x128xf32>
    %23 = vector.broadcast %18 : vector<1x128xf32> to vector<256x128xf32>
    %24 = arith.addf %22, %23 : vector<256x128xf32>
    %cst_13 = arith.constant 0.000000e+00 : f32
    %25 = vector.broadcast %cst_13 : f32 to vector<256x128xf32>
    %26 = arith.maximumf %24, %25 : vector<256x128xf32>
    %cst_14 = arith.constant dense<0.000000e+00> : vector<128xf32>
    %27 = vector.multi_reduction <add>, %26, %cst_14 [0] : vector<256x128xf32> to vector<128xf32>
    %28 = vector.shape_cast %27 : vector<128xf32> to vector<1x128xf32>
    %cst_15 = arith.constant 3.906250e-03 : f32
    %29 = vector.broadcast %cst_15 : f32 to vector<1x128xf32>
    %30 = arith.mulf %28, %29 : vector<1x128xf32>
    %c0_16 = arith.constant 0 : index
    %c0_17 = arith.constant 0 : index
    %c0_18 = arith.constant 0 : index
    %31 = vector.load %arg7[%c0_16, %c0_17, %c0_18] : memref<1x1x128xf32, #tpu.memory_space<vmem>>, vector<1x1x128xf32>
    %32 = vector.shape_cast %30 : vector<1x128xf32> to vector<1x1x128xf32>
    %33 = arith.addf %31, %32 : vector<1x1x128xf32>
    %c0_19 = arith.constant 0 : index
    %c0_20 = arith.constant 0 : index
    %c0_21 = arith.constant 0 : index
    %34 = vector.load %arg7[%c0_19, %c0_20, %c0_21] : memref<1x1x128xf32, #tpu.memory_space<vmem>>, vector<1x1x128xf32>
    tpu.vector_store %arg7[%c0_19, %c0_20, %c0_21], %33 {strides = array<i32>} : memref<1x1x128xf32, #tpu.memory_space<vmem>>, vector<1x1x128xf32>,
    return
  }
  func.func @transform_0(%arg0: i32, %arg1: i32) -> (i32, i32, i32) {
    %c0_i32 = arith.constant 0 : i32
    %c0_i32_0 = arith.constant 0 : i32
    return %arg0, %arg1, %c0_i32 : i32, i32, i32
  }
  func.func @transform_1(%arg0: i32, %arg1: i32) -> (i32, i32) {
    %c0_i32 = arith.constant 0 : i32
    %c0_i32_0 = arith.constant 0 : i32
    %c0_i32_1 = arith.constant 0 : i32
    return %c0_i32, %c0_i32_0 : i32, i32
  }
  func.func @transform_2(%arg0: i32, %arg1: i32) -> (i32, i32) {
    %c0_i32 = arith.constant 0 : i32
    %c0_i32_0 = arith.constant 0 : i32
    %c0_i32_1 = arith.constant 0 : i32
    return %c0_i32, %c0_i32_0 : i32, i32
  }
  func.func @transform_3(%arg0: i32, %arg1: i32) -> (i32, i32) {
    %c0_i32 = arith.constant 0 : i32
    %c0_i32_0 = arith.constant 0 : i32
    %c0_i32_1 = arith.constant 0 : i32
    return %c0_i32, %c0_i32_0 : i32, i32
  }
  func.func @transform_4(%arg0: i32, %arg1: i32) -> (i32, i32) {
    %c0_i32 = arith.constant 0 : i32
    %c0_i32_0 = arith.constant 0 : i32
    %c0_i32_1 = arith.constant 0 : i32
    return %c0_i32, %c0_i32_0 : i32, i32
  }
  func.func @transform_5(%arg0: i32, %arg1: i32) -> (i32, i32, i32) {
    %c0_i32 = arith.constant 0 : i32
    %c0_i32_0 = arith.constant 0 : i32
    %c0_i32_1 = arith.constant 0 : i32
    return %arg0, %c0_i32, %c0_i32_0 : i32, i32, i32
  }
}

module attributes {stable_mosaic.version = 11 : i64} {
  func.func @_stats_kernel(%arg0: i32, %arg1: i32, %arg2: memref<1x256x128xf32, #tpu.memory_space<vmem>>, %arg3: memref<1x128xf32, #tpu.memory_space<vmem>>, %arg4: memref<1x128xf32, #tpu.memory_space<vmem>>) attributes {dimension_semantics = [#tpu.dimension_semantics<arbitrary>, #tpu.dimension_semantics<arbitrary>], iteration_bounds = array<i64: 4, 1>, scalar_prefetch = 0 : i64, scratch_operands = 0 : i64, tpu.core_type = #tpu.core_type<tc>, window_params = [{transform_indices = @transform_0, window_bounds = array<i64: 1, 256, 128>}, {pipeline_mode = #tpu.pipeline_mode<synchronous>, transform_indices = @transform_1, window_bounds = array<i64: 1, 128>}, {pipeline_mode = #tpu.pipeline_mode<synchronous>, transform_indices = @transform_2, window_bounds = array<i64: 1, 128>}]} {
    %c0_i32 = arith.constant 0 : i32
    %0 = arith.cmpi eq, %arg0, %c0_i32 : i32
    %c0_i32_0 = arith.constant 0 : i32
    %1 = arith.cmpi eq, %arg1, %c0_i32_0 : i32
    %2 = arith.andi %0, %1 : i1
    %3 = arith.extui %2 : i1 to i32
    %c0_i32_1 = arith.constant 0 : i32
    %4 = arith.cmpi ne, %3, %c0_i32_1 : i32
    scf.if %4 {
      %cst_13 = arith.constant 0.000000e+00 : f32
      %18 = vector.broadcast %cst_13 : f32 to vector<1x128xf32>
      %c0_14 = arith.constant 0 : index
      %c0_15 = arith.constant 0 : index
      %19 = vector.load %arg3[%c0_14, %c0_15] : memref<1x128xf32, #tpu.memory_space<vmem>>, vector<1x128xf32>
      tpu.vector_store %arg3[%c0_14, %c0_15], %18 {strides = array<i32>} : memref<1x128xf32, #tpu.memory_space<vmem>>, vector<1x128xf32>,
      %cst_16 = arith.constant 0.000000e+00 : f32
      %20 = vector.broadcast %cst_16 : f32 to vector<1x128xf32>
      %c0_17 = arith.constant 0 : index
      %c0_18 = arith.constant 0 : index
      %21 = vector.load %arg4[%c0_17, %c0_18] : memref<1x128xf32, #tpu.memory_space<vmem>>, vector<1x128xf32>
      tpu.vector_store %arg4[%c0_17, %c0_18], %20 {strides = array<i32>} : memref<1x128xf32, #tpu.memory_space<vmem>>, vector<1x128xf32>,
    } else {
    }
    %c0 = arith.constant 0 : index
    %c0_2 = arith.constant 0 : index
    %c0_3 = arith.constant 0 : index
    %5 = vector.load %arg2[%c0, %c0_2, %c0_3] : memref<1x256x128xf32, #tpu.memory_space<vmem>>, vector<1x256x128xf32>
    %6 = vector.shape_cast %5 : vector<1x256x128xf32> to vector<256x128xf32>
    %c0_4 = arith.constant 0 : index
    %c0_5 = arith.constant 0 : index
    %7 = vector.load %arg3[%c0_4, %c0_5] : memref<1x128xf32, #tpu.memory_space<vmem>>, vector<1x128xf32>
    %cst = arith.constant dense<0.000000e+00> : vector<128xf32>
    %8 = vector.multi_reduction <add>, %6, %cst [0] : vector<256x128xf32> to vector<128xf32>
    %9 = vector.shape_cast %8 : vector<128xf32> to vector<1x128xf32>
    %10 = arith.addf %7, %9 : vector<1x128xf32>
    %c0_6 = arith.constant 0 : index
    %c0_7 = arith.constant 0 : index
    %11 = vector.load %arg3[%c0_6, %c0_7] : memref<1x128xf32, #tpu.memory_space<vmem>>, vector<1x128xf32>
    tpu.vector_store %arg3[%c0_6, %c0_7], %10 {strides = array<i32>} : memref<1x128xf32, #tpu.memory_space<vmem>>, vector<1x128xf32>,
    %c0_8 = arith.constant 0 : index
    %c0_9 = arith.constant 0 : index
    %12 = vector.load %arg4[%c0_8, %c0_9] : memref<1x128xf32, #tpu.memory_space<vmem>>, vector<1x128xf32>
    %13 = arith.mulf %6, %6 : vector<256x128xf32>
    %cst_10 = arith.constant dense<0.000000e+00> : vector<128xf32>
    %14 = vector.multi_reduction <add>, %13, %cst_10 [0] : vector<256x128xf32> to vector<128xf32>
    %15 = vector.shape_cast %14 : vector<128xf32> to vector<1x128xf32>
    %16 = arith.addf %12, %15 : vector<1x128xf32>
    %c0_11 = arith.constant 0 : index
    %c0_12 = arith.constant 0 : index
    %17 = vector.load %arg4[%c0_11, %c0_12] : memref<1x128xf32, #tpu.memory_space<vmem>>, vector<1x128xf32>
    tpu.vector_store %arg4[%c0_11, %c0_12], %16 {strides = array<i32>} : memref<1x128xf32, #tpu.memory_space<vmem>>, vector<1x128xf32>,
    return
  }
  func.func @transform_0(%arg0: i32, %arg1: i32) -> (i32, i32, i32) {
    %c0_i32 = arith.constant 0 : i32
    %c0_i32_0 = arith.constant 0 : i32
    return %arg0, %arg1, %c0_i32 : i32, i32, i32
  }
  func.func @transform_1(%arg0: i32, %arg1: i32) -> (i32, i32) {
    %c0_i32 = arith.constant 0 : i32
    %c0_i32_0 = arith.constant 0 : i32
    %c0_i32_1 = arith.constant 0 : i32
    return %c0_i32, %c0_i32_0 : i32, i32
  }
  func.func @transform_2(%arg0: i32, %arg1: i32) -> (i32, i32) {
    %c0_i32 = arith.constant 0 : i32
    %c0_i32_0 = arith.constant 0 : i32
    %c0_i32_1 = arith.constant 0 : i32
    return %c0_i32, %c0_i32_0 : i32, i32
  }
}

module attributes {stable_mosaic.version = 11 : i64} {
  func.func @_linear_kernel(%arg0: i32, %arg1: memref<8x128xf32, #tpu.memory_space<vmem>>, %arg2: memref<128x128xf32, #tpu.memory_space<vmem>>, %arg3: memref<1x128xf32, #tpu.memory_space<vmem>>, %arg4: memref<8x128xf32, #tpu.memory_space<vmem>>) attributes {dimension_semantics = [#tpu.dimension_semantics<parallel>], iteration_bounds = array<i64: 1>, scalar_prefetch = 0 : i64, scratch_operands = 0 : i64, tpu.core_type = #tpu.core_type<tc>, window_params = [{transform_indices = @transform_0, window_bounds = array<i64: 8, 128>}, {pipeline_mode = #tpu.pipeline_mode<synchronous>, transform_indices = @transform_1, window_bounds = array<i64: 128, 128>}, {pipeline_mode = #tpu.pipeline_mode<synchronous>, transform_indices = @transform_2, window_bounds = array<i64: 1, 128>}, {transform_indices = @transform_3, window_bounds = array<i64: 8, 128>}]} {
    %c0 = arith.constant 0 : index
    %c0_0 = arith.constant 0 : index
    %0 = vector.load %arg1[%c0, %c0_0] : memref<8x128xf32, #tpu.memory_space<vmem>>, vector<8x128xf32>
    %c0_1 = arith.constant 0 : index
    %c0_2 = arith.constant 0 : index
    %1 = vector.load %arg2[%c0_1, %c0_2] : memref<128x128xf32, #tpu.memory_space<vmem>>, vector<128x128xf32>
    %cst = arith.constant dense<0.000000e+00> : vector<8x128xf32>
    %2 = tpu.matmul %0, %1, %cst {dimension_numbers = #tpu.dot_dimension_numbers<[1], [0], [0], [1], [0, 0, 1, 1], [], []>} : vector<8x128xf32>, vector<128x128xf32>, vector<8x128xf32> -> vector<8x128xf32>
    %c0_3 = arith.constant 0 : index
    %c0_4 = arith.constant 0 : index
    %3 = vector.load %arg3[%c0_3, %c0_4] : memref<1x128xf32, #tpu.memory_space<vmem>>, vector<1x128xf32>
    %4 = vector.broadcast %3 : vector<1x128xf32> to vector<8x128xf32>
    %5 = arith.addf %2, %4 : vector<8x128xf32>
    %c0_5 = arith.constant 0 : index
    %c0_6 = arith.constant 0 : index
    %6 = vector.load %arg4[%c0_5, %c0_6] : memref<8x128xf32, #tpu.memory_space<vmem>>, vector<8x128xf32>
    tpu.vector_store %arg4[%c0_5, %c0_6], %5 {strides = array<i32>} : memref<8x128xf32, #tpu.memory_space<vmem>>, vector<8x128xf32>,
    return
  }
  func.func @transform_0(%arg0: i32) -> (i32, i32) {
    %c0_i32 = arith.constant 0 : i32
    %c0_i32_0 = arith.constant 0 : i32
    return %arg0, %c0_i32 : i32, i32
  }
  func.func @transform_1(%arg0: i32) -> (i32, i32) {
    %c0_i32 = arith.constant 0 : i32
    %c0_i32_0 = arith.constant 0 : i32
    %c0_i32_1 = arith.constant 0 : i32
    return %c0_i32, %c0_i32_0 : i32, i32
  }
  func.func @transform_2(%arg0: i32) -> (i32, i32) {
    %c0_i32 = arith.constant 0 : i32
    %c0_i32_0 = arith.constant 0 : i32
    %c0_i32_1 = arith.constant 0 : i32
    return %c0_i32, %c0_i32_0 : i32, i32
  }
  func.func @transform_3(%arg0: i32) -> (i32, i32) {
    %c0_i32 = arith.constant 0 : i32
    %c0_i32_0 = arith.constant 0 : i32
    return %arg0, %c0_i32 : i32, i32
  }
}

</mosaic_0001>

<bundles_post_ra>
// kernel: _classifier.3
= control target key start
LH: loop header
LB: loop body
LE: loop exit
PB: predicated region body
PF: predicated region fallthrough
CT: control target
= control target key end

     0   :  { %s431_s9 = smov 0   ;;  %s433_s10 = smov 0   ;;  %s513_s0 = inlined_call_operand.vmem [shape: f32[4,256,128], index: 0, kind: input, shape index: {}]   ;;  %s514_s1 = inlined_call_operand.vmem [shape: f32[1,128], index: 1, kind: output, shape index: {0}]   ;;  %s515_s2 = inlined_call_operand.vmem [shape: f32[1,128], index: 2, kind: output, shape index: {1}]  }
   0x1   :  { %s435_s11 = smov 0  }
   0x2 LB: > { %s25_s12 = sadd.s32 1, %s409_s10  ;;  %p358_p0 = scmp.ge.s32.totalorder %s413_s11, 1  ;;  %s413_s11 = sphi %s435_s11, %s13_s11   ;;  %s409_s10 = sphi %s433_s10, %s517_s10   ;;  %s405_s9 = sphi %s431_s9, %s516_s9  }
   0x3   : > { %p27_p1 = scmp.ge.s32.totalorder %s25_s12, 4  ;;  %p124_p2 = scmp.lt.s32.totalorder %s413_s11, 5 }
   0x5   : > { %s519_s12 = smov (%p27_p1, %s25_s12), 0  ;;  %p125_p3 = pnand %p358_p0, %p124_p2 }
   0x6   : > { %p146_p4 = scmp.lt.s32.totalorder (!%p125_p3), %s405_s9, 3  ;;  %p155_p5 = scmp.eq.s32.totalorder (!%p125_p3), %s405_s9, 0 }
   0x7   : > { %128 = sbr.rel (%p125_p3) target bundleno = 101 (0x65), region = 24 }
   0xe   : > { %s521_s9 = smov (!%p146_p4, %s405_s9), 3  ;;  %160 = sbr.rel (!%p155_p5) target bundleno = 21 (0x15), region = 28 }
   0xf   : > { %s364_s13 = sshll.u32 %s521_s9, 8  ;;  %v415_v0 = vmov (%p155_p5), 0.0  }
  0x10   : > { %s452_s16 = scalar_lea.vmem %s513_s0, %s364_s13  ;;  %161 = vst [vmem:[%s514_s1] sm:$0x1] (%p155_p5), %v415_v0  ;;  %162 = vst [vmem:[%s515_s2] sm:$0x1] (%p155_p5), %v415_v0 }
  0x15 PF: > { %v163_v1 = vld [vmem:[%s452_s16] sm:$0xff]  ;;  %v164_v2 = vld [vmem:[%s452_s16 + $0x8] sm:$0xff]  ;;  %v165_v3 = vld [vmem:[%s452_s16 + $0x10] sm:$0xff] }
  0x16   : > { %v166_v4 = vld [vmem:[%s452_s16 + $0x18] sm:$0xff]  ;;  %v196_v5 = vadd.f32 %v164_v2, %v163_v1  ;;  %v236_v6 = vmul.f32 %v163_v1, %v163_v1  ;;  %v237_v7 = vmul.f32 %v164_v2, %v164_v2  ;;  %v238_v8 = vmul.f32 %v165_v3, %v165_v3  ;;  %v167_v9 = vld [vmem:[%s452_s16 + $0x20] sm:$0xff]  ;;  %v168_v13 = vld [vmem:[%s452_s16 + $0x28] sm:$0xff] }
  0x17   : > { %v239_v11 = vmul.f32 %v166_v4, %v166_v4  ;;  %v240_v15 = vmul.f32 %v167_v9, %v167_v9  ;;  %v169_v17 = vld [vmem:[%s452_s16 + $0x30] sm:$0xff]  ;;  %v241_v19 = vmul.f32 %v168_v13, %v168_v13  ;;  %v170_v21 = vld [vmem:[%s452_s16 + $0x38] sm:$0xff]  ;;  %v171_v25 = vld [vmem:[%s452_s16 + $0x40] sm:$0xff] }
  0x18   : > { %v197_v10 = vadd.f32 %v196_v5, %v165_v3  ;;  %v268_v12 = vadd.f32 %v237_v7, %v236_v6  ;;  %v242_v23 = vmul.f32 %v169_v17, %v169_v17  ;;  %v243_v27 = vmul.f32 %v170_v21, %v170_v21  ;;  %v172_v29 = vld [vmem:[%s452_s16 + $0x48] sm:$0xff]  ;;  %v173_v33 = vld [vmem:[%s452_s16 + $0x50] sm:$0xff]  ;;  %v174_v37 = vld [vmem:[%s452_s16 + $0x58] sm:$0xff] }
  0x19   : > { %v244_v31 = vmul.f32 %v171_v25, %v171_v25  ;;  %v245_v35 = vmul.f32 %v172_v29, %v172_v29  ;;  %v246_v39 = vmul.f32 %v173_v33, %v173_v33  ;;  %v175_v41 = vld [vmem:[%s452_s16 + $0x60] sm:$0xff]  ;;  %v247_v43 = vmul.f32 %v174_v37, %v174_v37  ;;  %v176_v45 = vld [vmem:[%s452_s16 + $0x68] sm:$0xff]  ;;  %v177_v49 = vld [vmem:[%s452_s16 + $0x70] sm:$0xff] }
  0x1a   : > { %v198_v14 = vadd.f32 %v197_v10, %v166_v4  ;;  %v269_v16 = vadd.f32 %v268_v12, %v238_v8  ;;  %v248_v47 = vmul.f32 %v175_v41, %v175_v41  ;;  %v249_v51 = vmul.f32 %v176_v45, %v176_v45  ;;  %v178_v53 = vld [vmem:[%s452_s16 + $0x78] sm:$0xff]  ;;  %v179_v57 = vld [vmem:[%s452_s16 + $0x80] sm:$0xff]  ;;  %v180_v61 = vld [vmem:[%s452_s16 + $0x88] sm:$0xff] }
  0x1b   : > { %v250_v55 = vmul.f32 %v177_v49, %v177_v49  ;;  %v251_v59 = vmul.f32 %v178_v53, %v178_v53  ;;  %v252_v63 = vmul.f32 %v179_v57, %v179_v57  ;;  %v181_v1 = vld [vmem:[%s452_s16 + $0x90] sm:$0xff]  ;;  %v253_v3 = vmul.f32 %v180_v61, %v180_v61  ;;  %v182_v5 = vld [vmem:[%s452_s16 + $0x98] sm:$0xff] }
  0x1c   : > { %v199_v18 = vadd.f32 %v198_v14, %v167_v9  ;;  %v270_v20 = vadd.f32 %v269_v16, %v239_v11  ;;  %v254_v7 = vmul.f32 %v181_v1, %v181_v1  ;;  %v183_v9 = vld [vmem:[%s452_s16 + $0xa0] sm:$0xff]  ;;  %v255_v11 = vmul.f32 %v182_v5, %v182_v5 }
  0x1e   : > { %v200_v22 = vadd.f32 %v199_v18, %v168_v13  ;;  %v271_v24 = vadd.f32 %v270_v20, %v240_v15  ;;  %v184_v13 = vld [vmem:[%s452_s16 + $0xa8] sm:$0xff]  ;;  %v256_v15 = vmul.f32 %v183_v9, %v183_v9 }
  0x20   : > { %v201_v26 = vadd.f32 %v200_v22, %v169_v17  ;;  %v272_v28 = vadd.f32 %v271_v24, %v241_v19  ;;  %v185_v17 = vld [vmem:[%s452_s16 + $0xb0] sm:$0xff]  ;;  %v257_v19 = vmul.f32 %v184_v13, %v184_v13 }
  0x22   : > { %v202_v30 = vadd.f32 %v201_v26, %v170_v21  ;;  %v273_v32 = vadd.f32 %v272_v28, %v242_v23  ;;  %v186_v21 = vld [vmem:[%s452_s16 + $0xb8] sm:$0xff]  ;;  %v258_v23 = vmul.f32 %v185_v17, %v185_v17 }
  0x24   : > { %v203_v34 = vadd.f32 %v202_v30, %v171_v25  ;;  %v274_v36 = vadd.f32 %v273_v32, %v243_v27  ;;  %v187_v25 = vld [vmem:[%s452_s16 + $0xc0] sm:$0xff]  ;;  %v259_v27 = vmul.f32 %v186_v21, %v186_v21 }
  0x26   : > { %v204_v38 = vadd.f32 %v203_v34, %v172_v29  ;;  %v275_v40 = vadd.f32 %v274_v36, %v244_v31  ;;  %v188_v29 = vld [vmem:[%s452_s16 + $0xc8] sm:$0xff]  ;;  %v260_v31 = vmul.f32 %v187_v25, %v187_v25 }
  0x28   : > { %v205_v42 = vadd.f32 %v204_v38, %v173_v33  ;;  %v276_v44 = vadd.f32 %v275_v40, %v245_v35  ;;  %v189_v33 = vld [vmem:[%s452_s16 + $0xd0] sm:$0xff]  ;;  %v261_v35 = vmul.f32 %v188_v29, %v188_v29 }
  0x2a   : > { %v206_v46 = vadd.f32 %v205_v42, %v174_v37  ;;  %v277_v48 = vadd.f32 %v276_v44, %v246_v39  ;;  %v190_v37 = vld [vmem:[%s452_s16 + $0xd8] sm:$0xff]  ;;  %v262_v39 = vmul.f32 %v189_v33, %v189_v33 }
  0x2c   : > { %v207_v50 = vadd.f32 %v206_v46, %v175_v41  ;;  %v278_v52 = vadd.f32 %v277_v48, %v247_v43  ;;  %v191_v41 = vld [vmem:[%s452_s16 + $0xe0] sm:$0xff]  ;;  %v263_v43 = vmul.f32 %v190_v37, %v190_v37 }
  0x2e   : > { %v208_v54 = vadd.f32 %v207_v50, %v176_v45  ;;  %v279_v56 = vadd.f32 %v278_v52, %v248_v47  ;;  %v192_v45 = vld [vmem:[%s452_s16 + $0xe8] sm:$0xff]  ;;  %v264_v47 = vmul.f32 %v191_v41, %v191_v41 }
  0x30   : > { %v209_v58 = vadd.f32 %v208_v54, %v177_v49  ;;  %v280_v60 = vadd.f32 %v279_v56, %v249_v51  ;;  %v193_v49 = vld [vmem:[%s452_s16 + $0xf0] sm:$0xff]  ;;  %v265_v51 = vmul.f32 %v192_v45, %v192_v45 }
  0x32   : > { %v210_v62 = vadd.f32 %v209_v58, %v178_v53  ;;  %v281_v0 = vadd.f32 %v280_v60, %v250_v55  ;;  %v194_v53 = vld [vmem:[%s452_s16 + $0xf8] sm:$0xff]  ;;  %v266_v55 = vmul.f32 %v193_v49, %v193_v49 }
  0x33   : > { %v267_v58 = vmul.f32 %v194_v53, %v194_v53 }
  0x34   : > { %v211_v2 = vadd.f32 %v210_v62, %v179_v57  ;;  %v282_v4 = vadd.f32 %v281_v0, %v251_v59 }
  0x36   : > { %v212_v6 = vadd.f32 %v211_v2, %v180_v61  ;;  %v283_v8 = vadd.f32 %v282_v4, %v252_v63 }
  0x38   : > { %v213_v10 = vadd.f32 %v212_v6, %v181_v1  ;;  %v284_v12 = vadd.f32 %v283_v8, %v253_v3 }
  0x3a   : > { %v214_v14 = vadd.f32 %v213_v10, %v182_v5  ;;  %v285_v16 = vadd.f32 %v284_v12, %v254_v7  ;;  %v195_v7 = vld [vmem:[%s514_s1] sm:$0x1] }
  0x3b   : > { %v235_v12 = vld [vmem:[%s515_s2] sm:$0x1] }
  0x3c   : > { %v215_v18 = vadd.f32 %v214_v14, %v183_v9  ;;  %v286_v20 = vadd.f32 %v285_v16, %v255_v11 }
  0x3e   : > { %v216_v22 = vadd.f32 %v215_v18, %v184_v13  ;;  %v287_v24 = vadd.f32 %v286_v20, %v256_v15 }
  0x40   : > { %v217_v26 = vadd.f32 %v216_v22, %v185_v17  ;;  %v288_v28 = vadd.f32 %v287_v24, %v257_v19 }
  0x42   : > { %v218_v30 = vadd.f32 %v217_v26, %v186_v21  ;;  %v289_v32 = vadd.f32 %v288_v28, %v258_v23 }
  0x44   : > { %v219_v34 = vadd.f32 %v218_v30, %v187_v25  ;;  %v290_v36 = vadd.f32 %v289_v32, %v259_v27 }
  0x46   : > { %v220_v38 = vadd.f32 %v219_v34, %v188_v29  ;;  %v291_v40 = vadd.f32 %v290_v36, %v260_v31 }
  0x48   : > { %v221_v42 = vadd.f32 %v220_v38, %v189_v33  ;;  %v292_v44 = vadd.f32 %v291_v40, %v261_v35 }
  0x4a   : > { %v222_v46 = vadd.f32 %v221_v42, %v190_v37  ;;  %v293_v48 = vadd.f32 %v292_v44, %v262_v39 }
  0x4c   : > { %v223_v50 = vadd.f32 %v222_v46, %v191_v41  ;;  %v294_v52 = vadd.f32 %v293_v48, %v263_v43 }
  0x4e   : > { %v224_v54 = vadd.f32 %v223_v50, %v192_v45  ;;  %v295_v56 = vadd.f32 %v294_v52, %v264_v47 }
  0x50   : > { %v225_v57 = vadd.f32 %v224_v54, %v193_v49  ;;  %v296_v59 = vadd.f32 %v295_v56, %v265_v51 }
  0x52   : > { %v226_v60 = vadd.f32 %v225_v57, %v194_v53  ;;  %v297_v61 = vadd.f32 %v296_v59, %v266_v55 }
  0x54   : > { %v227_v62 = vrot.slane %v226_v60, 4  ;;  %v298_v63 = vadd.f32 %v297_v61, %v267_v58 }
  0x56   : > { %v228_v0 = vadd.f32 %v227_v62, %v226_v60  ;;  %v299_v1 = vrot.slane %v298_v63, 4 }
  0x58   : > { %v229_v2 = vrot.slane %v228_v0, 2  ;;  %v300_v3 = vadd.f32 %v299_v1, %v298_v63 }
  0x5a   : > { %v230_v4 = vadd.f32 %v229_v2, %v228_v0  ;;  %v301_v5 = vrot.slane %v300_v3, 2 }
  0x5c   : > { %v231_v6 = vrot.slane %v230_v4, 1  ;;  %v302_v8 = vadd.f32 %v301_v5, %v300_v3 }
  0x5e   : > { %v232_v9 = vadd.f32 %v231_v6, %v230_v4  ;;  %v303_v10 = vrot.slane %v302_v8, 1 }
  0x60   : > { %v233_v11 = vadd.f32 %v232_v9, %v195_v7  ;;  %v304_v13 = vadd.f32 %v303_v10, %v302_v8 }
  0x62   : > { %234 = vst [vmem:[%s514_s1] sm:$0x1] %v233_v11  ;;  %v305_v14 = vadd.f32 %v304_v13, %v235_v12 }
  0x64   : > { %306 = vst [vmem:[%s515_s2] sm:$0x1] %v305_v14 }
  0x65 PF: > { %s13_s11 = sadd.s32 1, %s413_s11   ;;  %s516_s9 = smov %s409_s10 }
  0x66   : > { %p10_p6 = scmp.ge.s32.totalorder %s13_s11, 6   ;;  %s517_s10 = smov %s519_s12 }
  0x68   :  { %12 = sbr.rel (!%p10_p6) target bundleno = 2 (0x2), region = 62 }

// kernel: _classifier.4
= control target key start
LH: loop header
LB: loop body
LE: loop exit
PB: predicated region body
PF: predicated region fallthrough
CT: control target
= control target key end

     0   :  { %s601_s18 = smov 0   ;;  %s603_s19 = smov 0   ;;  %s753_s0 = inlined_call_operand.vmem [shape: f32[4,256,128], index: 0, kind: input, shape index: {}]   ;;  %s754_s1 = inlined_call_operand.vmem [shape: f32[1,128], index: 1, kind: input, shape index: {}]   ;;  %s755_s2 = inlined_call_operand.vmem [shape: f32[1,128], index: 2, kind: input, shape index: {}]   ;;  %s756_s3 = inlined_call_operand.vmem [shape: f32[1,128], index: 3, kind: input, shape index: {}]   ;;  %s757_s4 = inlined_call_operand.vmem [shape: f32[1,128], index: 4, kind: input, shape index: {}]   ;;  %s758_s5 = inlined_call_operand.vmem [shape: f32[4,1,128], index: 5, kind: output, shape index: {}]  }
   0x1   :  { %s605_s20 = smov 0  }
   0x2 LB: > { %s27_s21 = sadd.s32 1, %s564_s19  ;;  %p513_p0 = scmp.ge.s32.totalorder %s568_s20, 1  ;;  %s568_s20 = sphi %s605_s20, %s15_s20   ;;  %s564_s19 = sphi %s603_s19, %s760_s19   ;;  %s560_s18 = sphi %s601_s18, %s759_s18  }
   0x3   : > { %p29_p1 = scmp.ge.s32.totalorder %s27_s21, 4  ;;  %p206_p2 = scmp.lt.s32.totalorder %s568_s20, 5 }
   0x5   : > { %s762_s21 = smov (%p29_p1, %s27_s21), 0  ;;  %p207_p3 = pnand %p513_p0, %p206_p2 }
   0x6   : > { %p237_p4 = scmp.lt.s32.totalorder (!%p207_p3), %s560_s18, 3  ;;  %v254_v0 = vld [vmem:[%s754_s1] sm:$0x1] (!%p207_p3)  ;;  %v570_v5 = vmov (!%p207_p3), 0.0   ;;  %v300_v8 = vlaneseq (!%p207_p3) }
   0x7   : > { %210 = sbr.rel (%p207_p3) target bundleno = 117 (0x75), region = 40  ;;  %v256_v1 = vld [vmem:[%s755_s2] sm:$0x1] (!%p207_p3)  ;;  %v255_v2 = vmul.f32 (!%p207_p3), 0.0009765625, %v254_v0 }
   0x8   : > { %v257_v3 = vmul.f32 (!%p207_p3), 0.0009765625, %v256_v1  ;;  %v260_v10 = vld [vmem:[%s756_s3] sm:$0x1] (!%p207_p3)  ;;  %v301_v12 = vshrl.u32 (!%p207_p3), %v300_v8, 7 }
   0x9   : > { %v258_v4 = vmul.f32 (!%p207_p3), %v255_v2, %v255_v2  ;;  %v264_v15 = vld [vmem:[%s757_s4] sm:$0x1] (!%p207_p3) }
   0xa   : > { %v302_v14 = vsub.s32 (!%p207_p3), 0, %v301_v12 }
   0xb   : > { %v259_v6 = vsub.f32 (!%p207_p3), %v257_v3, %v258_v4 }
   0xd   : > { %v261_v7 = vadd.f32 (!%p207_p3), 1e-05, %v259_v6 }
   0xe   : > { %s764_s18 = smov (!%p237_p4, %s560_s18), 3 }
   0xf   : > { %s628_s28 = scalar_lea.vmem %s758_s5, %s764_s18  ;;  %544 = vrsqrt.f32 %v261_v7  ;;  %s518_s6 = sshll.u32 %s764_s18, 8 }
  0x10   : > { %253 = vst [vmem:[%s628_s28] sm:$0x1] %v570_v5  ;;  %s640_s11 = scalar_lea.vmem %s753_s0, %s518_s6 }
  0x11   : > { %v267_v18 = vld [vmem:[%s640_s11] sm:$0xff]  ;;  %v268_v19 = vld [vmem:[%s640_s11 + $0x8] sm:$0xff]  ;;  %v269_v20 = vld [vmem:[%s640_s11 + $0x10] sm:$0xff] }
  0x12   : > { %v270_v24 = vld [vmem:[%s640_s11 + $0x18] sm:$0xff]  ;;  %v271_v26 = vld [vmem:[%s640_s11 + $0x20] sm:$0xff]  ;;  %v272_v30 = vld [vmem:[%s640_s11 + $0x28] sm:$0xff] }
  0x13   : > { %v273_v33 = vld [vmem:[%s640_s11 + $0x30] sm:$0xff]  ;;  %v274_v38 = vld [vmem:[%s640_s11 + $0x38] sm:$0xff]  ;;  %v275_v42 = vld [vmem:[%s640_s11 + $0x40] sm:$0xff] }
  0x14   : > { %v276_v47 = vld [vmem:[%s640_s11 + $0x48] sm:$0xff]  ;;  %v277_v52 = vld [vmem:[%s640_s11 + $0x50] sm:$0xff]  ;;  %v278_v57 = vld [vmem:[%s640_s11 + $0x58] sm:$0xff] }
  0x15   : > { %v279_v62 = vld [vmem:[%s640_s11 + $0x60] sm:$0xff]  ;;  %v280_v3 = vld [vmem:[%s640_s11 + $0x68] sm:$0xff]  ;;  %v281_v8 = vld [vmem:[%s640_s11 + $0x70] sm:$0xff] }
  0x19   : > { %v545_v9 = vpop.eup %544 }
  0x1a   : > { %v263_v11 = vmul.f32 %v545_v9, %v260_v10 }
  0x1c   : > { %v265_v13 = vmul.f32 %v263_v11, %v255_v2  ;;  %v642_v17 = vrot.slane %v263_v11, %v302_v14 }
  0x1e   : > { %v266_v16 = vsub.f32 %v264_v15, %v265_v13  ;;  %v305_v21 = vmul.f32 %v642_v17, %v267_v18  ;;  %v306_v22 = vmul.f32 %v642_v17, %v268_v19  ;;  %v307_v25 = vmul.f32 %v642_v17, %v269_v20  ;;  %v282_v13 = vld [vmem:[%s640_s11 + $0x78] sm:$0xff]  ;;  %v283_v19 = vld [vmem:[%s640_s11 + $0x80] sm:$0xff] }
  0x1f   : > { %v308_v27 = vmul.f32 %v642_v17, %v270_v24  ;;  %v309_v31 = vmul.f32 %v642_v17, %v271_v26  ;;  %v310_v34 = vmul.f32 %v642_v17, %v272_v30  ;;  %v311_v39 = vmul.f32 %v642_v17, %v273_v33  ;;  %v285_v30 = vld [vmem:[%s640_s11 + $0x90] sm:$0xff] }
  0x20   : > { %v649_v23 = vrot.slane %v266_v16, %v302_v14  ;;  %v312_v43 = vmul.f32 %v642_v17, %v274_v38  ;;  %v313_v48 = vmul.f32 %v642_v17, %v275_v42  ;;  %v314_v53 = vmul.f32 %v642_v17, %v276_v47 }
  0x21   : > { %v315_v58 = vmul.f32 %v642_v17, %v277_v52  ;;  %v316_v63 = vmul.f32 %v642_v17, %v278_v57  ;;  %v317_v4 = vmul.f32 %v642_v17, %v279_v62  ;;  %v318_v9 = vmul.f32 %v642_v17, %v280_v3 }
  0x22   : > { %v343_v28 = vadd.f32 %v649_v23, %v305_v21  ;;  %v344_v29 = vadd.f32 %v649_v23, %v306_v22  ;;  %v345_v32 = vadd.f32 %v649_v23, %v307_v25  ;;  %v346_v35 = vadd.f32 %v649_v23, %v308_v27  ;;  %v284_v25 = vld [vmem:[%s640_s11 + $0x88] sm:$0xff] }
  0x23   : > { %v347_v40 = vadd.f32 %v649_v23, %v309_v31  ;;  %v348_v44 = vadd.f32 %v649_v23, %v310_v34  ;;  %v349_v49 = vadd.f32 %v649_v23, %v311_v39  ;;  %v350_v54 = vadd.f32 %v649_v23, %v312_v43 }
  0x24   : > { %v375_v36 = vmax.f32 %v343_v28, 0.0  ;;  %v376_v37 = vmax.f32 %v344_v29, 0.0  ;;  %v377_v41 = vmax.f32 %v345_v32, 0.0  ;;  %v378_v45 = vmax.f32 %v346_v35, 0.0  ;;  %v286_v35 = vld [vmem:[%s640_s11 + $0x98] sm:$0xff] }
  0x25   : > { %v379_v50 = vmax.f32 %v347_v40, 0.0  ;;  %v380_v55 = vmax.f32 %v348_v44, 0.0  ;;  %v351_v59 = vadd.f32 %v649_v23, %v313_v48  ;;  %v381_v60 = vmax.f32 %v349_v49, 0.0  ;;  %v287_v40 = vld [vmem:[%s640_s11 + $0xa0] sm:$0xff] }
  0x26   : > { %v407_v46 = vadd.f32 %v376_v37, %v375_v36  ;;  %v352_v0 = vadd.f32 %v649_v23, %v314_v53  ;;  %v382_v1 = vmax.f32 %v350_v54, 0.0  ;;  %v353_v5 = vadd.f32 %v649_v23, %v315_v58 }
  0x27   : > { %v383_v6 = vmax.f32 %v351_v59, 0.0  ;;  %v354_v10 = vadd.f32 %v649_v23, %v316_v63  ;;  %v319_v14 = vmul.f32 %v642_v17, %v281_v8  ;;  %v355_v15 = vadd.f32 %v649_v23, %v317_v4 }
  0x28   : > { %v408_v51 = vadd.f32 %v407_v46, %v377_v41  ;;  %v384_v11 = vmax.f32 %v352_v0, 0.0  ;;  %v385_v16 = vmax.f32 %v353_v5, 0.0  ;;  %v320_v20 = vmul.f32 %v642_v17, %v282_v13 }
  0x29   : > { %v356_v21 = vadd.f32 %v649_v23, %v318_v9  ;;  %v386_v22 = vmax.f32 %v354_v10, 0.0  ;;  %v321_v26 = vmul.f32 %v642_v17, %v283_v19  ;;  %v357_v27 = vadd.f32 %v649_v23, %v319_v14 }
  0x2a   : > { %v409_v56 = vadd.f32 %v408_v51, %v378_v45  ;;  %v387_v28 = vmax.f32 %v355_v15, 0.0  ;;  %v322_v31 = vmul.f32 %v642_v17, %v284_v25  ;;  %v358_v32 = vadd.f32 %v649_v23, %v320_v20  ;;  %v288_v45 = vld [vmem:[%s640_s11 + $0xa8] sm:$0xff] }
  0x2b   : > { %v388_v33 = vmax.f32 %v356_v21, 0.0  ;;  %v323_v36 = vmul.f32 %v642_v17, %v285_v30  ;;  %v359_v37 = vadd.f32 %v649_v23, %v321_v26  ;;  %v389_v38 = vmax.f32 %v357_v27, 0.0 }
  0x2c   : > { %v410_v61 = vadd.f32 %v409_v56, %v379_v50  ;;  %v324_v41 = vmul.f32 %v642_v17, %v286_v35  ;;  %v360_v42 = vadd.f32 %v649_v23, %v322_v31  ;;  %v390_v43 = vmax.f32 %v358_v32, 0.0  ;;  %v289_v50 = vld [vmem:[%s640_s11 + $0xb0] sm:$0xff] }
  0x2d   : > { %v325_v46 = vmul.f32 %v642_v17, %v287_v40  ;;  %v361_v47 = vadd.f32 %v649_v23, %v323_v36  ;;  %v391_v48 = vmax.f32 %v359_v37, 0.0  ;;  %v326_v51 = vmul.f32 %v642_v17, %v288_v45 }
  0x2e   : > { %v411_v2 = vadd.f32 %v410_v61, %v380_v55  ;;  %v362_v52 = vadd.f32 %v649_v23, %v324_v41  ;;  %v392_v53 = vmax.f32 %v360_v42, 0.0  ;;  %v290_v55 = vld [vmem:[%s640_s11 + $0xb8] sm:$0xff]  ;;  %v327_v56 = vmul.f32 %v642_v17, %v289_v50 }
  0x2f   : > { %v363_v57 = vadd.f32 %v649_v23, %v325_v46  ;;  %v393_v58 = vmax.f32 %v361_v47, 0.0  ;;  %v328_v61 = vmul.f32 %v642_v17, %v290_v55  ;;  %v364_v62 = vadd.f32 %v649_v23, %v326_v51 }
  0x30   : > { %v412_v7 = vadd.f32 %v411_v2, %v381_v60  ;;  %v291_v60 = vld [vmem:[%s640_s11 + $0xc0] sm:$0xff]  ;;  %v394_v63 = vmax.f32 %v362_v52, 0.0  ;;  %v365_v3 = vadd.f32 %v649_v23, %v327_v56 }
  0x31   : > { %v329_v2 = vmul.f32 %v642_v17, %v291_v60  ;;  %v395_v4 = vmax.f32 %v363_v57, 0.0  ;;  %v366_v8 = vadd.f32 %v649_v23, %v328_v61  ;;  %v396_v9 = vmax.f32 %v364_v62, 0.0 }
  0x32   : > { %v413_v12 = vadd.f32 %v412_v7, %v382_v1  ;;  %v292_v1 = vld [vmem:[%s640_s11 + $0xc8] sm:$0xff]  ;;  %v397_v14 = vmax.f32 %v365_v3, 0.0 }
  0x33   : > { %v330_v7 = vmul.f32 %v642_v17, %v292_v1  ;;  %v367_v13 = vadd.f32 %v649_v23, %v329_v2  ;;  %v398_v20 = vmax.f32 %v366_v8, 0.0 }
  0x34   : > { %v414_v18 = vadd.f32 %v413_v12, %v383_v6  ;;  %v293_v6 = vld [vmem:[%s640_s11 + $0xd0] sm:$0xff] }
  0x35   : > { %v331_v12 = vmul.f32 %v642_v17, %v293_v6  ;;  %v368_v19 = vadd.f32 %v649_v23, %v330_v7  ;;  %v399_v26 = vmax.f32 %v367_v13, 0.0 }
  0x36   : > { %v415_v24 = vadd.f32 %v414_v18, %v384_v11  ;;  %v294_v11 = vld [vmem:[%s640_s11 + $0xd8] sm:$0xff] }
  0x37   : > { %v332_v18 = vmul.f32 %v642_v17, %v294_v11  ;;  %v369_v25 = vadd.f32 %v649_v23, %v331_v12  ;;  %v400_v31 = vmax.f32 %v368_v19, 0.0 }
  0x38   : > { %v416_v29 = vadd.f32 %v415_v24, %v385_v16  ;;  %v295_v16 = vld [vmem:[%s640_s11 + $0xe0] sm:$0xff] }
  0x39   : > { %v333_v24 = vmul.f32 %v642_v17, %v295_v16  ;;  %v370_v30 = vadd.f32 %v649_v23, %v332_v18  ;;  %v401_v36 = vmax.f32 %v369_v25, 0.0 }
  0x3a   : > { %v417_v34 = vadd.f32 %v416_v29, %v386_v22  ;;  %v296_v22 = vld [vmem:[%s640_s11 + $0xe8] sm:$0xff] }
  0x3b   : > { %v334_v29 = vmul.f32 %v642_v17, %v296_v22  ;;  %v371_v35 = vadd.f32 %v649_v23, %v333_v24  ;;  %v402_v40 = vmax.f32 %v370_v30, 0.0 }
  0x3c   : > { %v418_v39 = vadd.f32 %v417_v34, %v387_v28  ;;  %v297_v28 = vld [vmem:[%s640_s11 + $0xf0] sm:$0xff] }
  0x3d   : > { %v335_v34 = vmul.f32 %v642_v17, %v297_v28 }
  0x3e   : > { %v419_v44 = vadd.f32 %v418_v39, %v388_v33  ;;  %v298_v33 = vld [vmem:[%s640_s11 + $0xf8] sm:$0xff]  ;;  %v372_v39 = vadd.f32 %v649_v23, %v334_v29 }
  0x3f   : > { %v373_v42 = vadd.f32 %v649_v23, %v335_v34 }
  0x40   : > { %v420_v49 = vadd.f32 %v419_v44, %v389_v38  ;;  %v336_v38 = vmul.f32 %v642_v17, %v298_v33  ;;  %v404_v46 = vmax.f32 %v372_v39, 0.0 }
  0x42   : > { %v421_v54 = vadd.f32 %v420_v49, %v390_v43  ;;  %v403_v43 = vmax.f32 %v371_v35, 0.0  ;;  %v374_v45 = vadd.f32 %v649_v23, %v336_v38 }
  0x44   : > { %v422_v59 = vadd.f32 %v421_v54, %v391_v48  ;;  %v405_v48 = vmax.f32 %v373_v42, 0.0  ;;  %v406_v50 = vmax.f32 %v374_v45, 0.0 }
  0x46   : > { %v423_v0 = vadd.f32 %v422_v59, %v392_v53  ;;  %v445_v59 = vld [vmem:[%s628_s28] sm:$0x1] }
  0x48   : > { %v424_v5 = vadd.f32 %v423_v0, %v393_v58 }
  0x4a   : > { %v425_v10 = vadd.f32 %v424_v5, %v394_v63 }
  0x4c   : > { %v426_v15 = vadd.f32 %v425_v10, %v395_v4 }
  0x4e   : > { %v427_v21 = vadd.f32 %v426_v15, %v396_v9 }
  0x50   : > { %v428_v27 = vadd.f32 %v427_v21, %v397_v14 }
  0x52   : > { %v429_v32 = vadd.f32 %v428_v27, %v398_v20 }
  0x54   : > { %v430_v37 = vadd.f32 %v429_v32, %v399_v26 }
  0x56   : > { %v431_v41 = vadd.f32 %v430_v37, %v400_v31 }
  0x58   : > { %v432_v44 = vadd.f32 %v431_v41, %v401_v36 }
  0x5a   : > { %v433_v47 = vadd.f32 %v432_v44, %v402_v40 }
  0x5c   : > { %v434_v49 = vadd.f32 %v433_v47, %v403_v43 }
  0x5e   : > { %v435_v51 = vadd.f32 %v434_v49, %v404_v46 }
  0x60   : > { %v436_v52 = vadd.f32 %v435_v51, %v405_v48 }
  0x62   : > { %v437_v17 = vadd.f32 %v436_v52, %v406_v50 }
  0x64   : > { %v438_v53 = vrot.slane %v437_v17, 4 }
  0x66   : > { %v439_v54 = vadd.f32 %v438_v53, %v437_v17 }
  0x68   : > { %v440_v55 = vrot.slane %v439_v54, 2 }
  0x6a   : > { %v441_v56 = vadd.f32 %v440_v55, %v439_v54 }
  0x6c   : > { %v442_v57 = vrot.slane %v441_v56, 1 }
  0x6e   : > { %v443_v58 = vadd.f32 %v442_v57, %v441_v56 }
  0x70   : > { %v444_v60 = vmul.f32 0.00390625, %v443_v58 }
  0x72   : > { %v446_v61 = vadd.f32 %v445_v59, %v444_v60 }
  0x74   : > { %447 = vst [vmem:[%s628_s28] sm:$0x1] %v446_v61 }
  0x75 PF: > { %s15_s20 = sadd.s32 1, %s568_s20   ;;  %s759_s18 = smov %s564_s19 }
  0x76   : > { %p12_p5 = scmp.ge.s32.totalorder %s15_s20, 6   ;;  %s760_s19 = smov %s762_s21 }
  0x78   :  { %14 = sbr.rel (!%p12_p5) target bundleno = 2 (0x2), region = 74 }

// kernel: _classifier.5
= control target key start
LH: loop header
LB: loop body
LE: loop exit
PB: predicated region body
PF: predicated region fallthrough
CT: control target
= control target key end

     0   :  { %v193_v0 = vmov 0.0|0.0   ;;  %vm194_vm0 = vmmov 0   ;;  %v195_v4 = vmov 0.0   ;;  %s273_s1 = inlined_call_operand.vmem [shape: f32[128,128], index: 1, kind: input, shape index: {}]   ;;  %s274_s0 = inlined_call_operand.vmem [shape: f32[8,128], index: 0, kind: input, shape index: {}]   ;;  %s275_s2 = inlined_call_operand.vmem [shape: f32[1,128], index: 2, kind: input, shape index: {}]   ;;  %s276_s3 = inlined_call_operand.vmem [shape: f32[8,128], index: 3, kind: output, shape index: {}]  }
   0x1   :  { %166 = vmatprep.subr.bf16.mxu0 %v193_v0  ;;  %v15_v1 = vld [vmem:[%s273_s1] sm:$0xff]  ;;  %v16_v2 = vld [vmem:[%s273_s1 + $0x8] sm:$0xff]  ;;  %v17_v3 = vld [vmem:[%s273_s1 + $0x10] sm:$0xff]  ;;  %163 = vmatprep.mubr.msk.f32.mxu0 %vm194_vm0, %v195_v4 }
   0x2   :  { %v167_v5 = vpack.c.bf16 %v16_v2, %v15_v1  ;;  %v18_v6 = vld [vmem:[%s273_s1 + $0x18] sm:$0xff]  ;;  %v19_v8 = vld [vmem:[%s273_s1 + $0x20] sm:$0xff]  ;;  %v20_v9 = vld [vmem:[%s273_s1 + $0x28] sm:$0xff] }
   0x3   :  { %v170_v7 = vpack.c.bf16 %v18_v6, %v17_v3  ;;  %v173_v10 = vpack.c.bf16 %v20_v9, %v19_v8  ;;  %v21_v11 = vld [vmem:[%s273_s1 + $0x30] sm:$0xff]  ;;  %v22_v12 = vld [vmem:[%s273_s1 + $0x38] sm:$0xff]  ;;  %v23_v14 = vld [vmem:[%s273_s1 + $0x40] sm:$0xff] }
   0x4   :  { %168 = vmatpush3.bf16.msra.mxu0 %v167_v5  ;;  %v176_v13 = vpack.c.bf16 %v22_v12, %v21_v11  ;;  %v24_v15 = vld [vmem:[%s273_s1 + $0x48] sm:$0xff]  ;;  %v25_v17 = vld [vmem:[%s273_s1 + $0x50] sm:$0xff]  ;;  %v26_v18 = vld [vmem:[%s273_s1 + $0x58] sm:$0xff] }
   0x5   :  { %169 = vmatprep.subr.bf16.mxu0 %v193_v0  ;;  %v179_v16 = vpack.c.bf16 %v24_v15, %v23_v14  ;;  %v182_v19 = vpack.c.bf16 %v26_v18, %v25_v17  ;;  %v27_v20 = vld [vmem:[%s273_s1 + $0x60] sm:$0xff]  ;;  %v28_v21 = vld [vmem:[%s273_s1 + $0x68] sm:$0xff]  ;;  %v29_v23 = vld [vmem:[%s273_s1 + $0x70] sm:$0xff] }
   0x6   :  { %v185_v22 = vpack.c.bf16 %v28_v21, %v27_v20  ;;  %v30_v24 = vld [vmem:[%s273_s1 + $0x78] sm:$0xff]  ;;  %v14_v26 = vld [vmem:[%s274_s0] sm:$0xff] }
   0x7   :  { %v188_v25 = vpack.c.bf16 %v30_v24, %v29_v23  ;;  %v113_v27 = vld [vmem:[%s275_s2] ss:$0 sm:$0xff] }
   0x8   :  { %171 = vmatpush3.bf16.msra.mxu0 %v170_v7 }
   0x9   :  { %172 = vmatprep.subr.bf16.mxu0 %v193_v0 }
   0xc   :  { %174 = vmatpush3.bf16.msra.mxu0 %v173_v10 }
   0xd   :  { %175 = vmatprep.subr.bf16.mxu0 %v193_v0 }
  0x10   :  { %177 = vmatpush3.bf16.msra.mxu0 %v176_v13 }
  0x11   :  { %178 = vmatprep.subr.bf16.mxu0 %v193_v0 }
  0x14   :  { %180 = vmatpush3.bf16.msra.mxu0 %v179_v16 }
  0x15   :  { %181 = vmatprep.subr.bf16.mxu0 %v193_v0 }
  0x18   :  { %183 = vmatpush3.bf16.msra.mxu0 %v182_v19 }
  0x19   :  { %184 = vmatprep.subr.bf16.mxu0 %v193_v0 }
  0x1c   :  { %186 = vmatpush3.bf16.msra.mxu0 %v185_v22 }
  0x1d   :  { %187 = vmatprep.subr.bf16.mxu0 %v193_v0 }
  0x20   :  { %189 = vmatpush3.bf16.msra.mxu0 %v188_v25 }
  0x23   :  { %164 = vmatmul.mubr.f32.vlgmr.msra.gmra.mrb[0].mxu0 %v14_v26 }
  0xf6   :  { %v104_v28 = vpop.f32.mrb[0].mxu0 }
  0xf7   :  { %v105_v29 = vadd.f32 %v113_v27, %v104_v28  ;;  %v165_v30 = vpop.f32.mrb[1].mxu0 }
  0xf9   :  { %108 = vst [vmem:[%s276_s3] sm:$0xff] %v105_v29 }

</bundles_post_ra>
